<compile_context>
chip_gen: v5e
topology: v5e:2x2
jax: 0.10.0
libtpu: 0.0.40
codegen_flags: <defaults>
</compile_context>

<pallas_src>
import jax
import jax.numpy as jnp
from jax.experimental import pallas as pl
from jax.experimental.pallas import tpu as pltpu  # noqa: F401  (kept for CompilerParams if N is scaled up)


def _selector_kernel(attn_ref, p0_ref, p1_ref, o0_ref, o1_ref):
    """Single invocation over the whole problem.

    attn_ref: (P, 1) f32 in VMEM  -- raw policy_attn, lane-broadcast over N
    p0_ref  : (P, N) f32 in VMEM  -- policies[..., 0]
    p1_ref  : (P, N) f32 in VMEM  -- policies[..., 1]
    o0_ref  : (P, N) f32 in VMEM  -- softmax probability of action 0
    o1_ref  : (P, N) f32 in VMEM  -- softmax probability of action 1
    """
    a = attn_ref[...]                 # (P, 1) -> broadcast across the lane (N) axis
    x0 = p0_ref[...] * a              # einsum('ijk,i->ijk', policies, attn)[..., 0]
    x1 = p1_ref[...] * a              # einsum('ijk,i->ijk', policies, attn)[..., 1]
    # 2-way softmax over the action axis via the sigmoid identity (VPU + 1 EUP exp).
    e = jnp.exp(x1 - x0)
    s0 = 1.0 / (1.0 + e)              # = exp(x0) / (exp(x0) + exp(x1))
    o0_ref[...] = s0
    o1_ref[...] = 1.0 - s0


def cartpole_policy_selector(policies: jax.Array, policy_attn: jax.Array) -> jax.Array:
    """policies: (P, N, 2) or (P, 2) float32; policy_attn: (P,) float32 (raw parameter)."""
    assert policies.shape[0] == policy_attn.shape[0]
    assert policies.shape[-1] == 2
    squeeze = policies.ndim == 2
    if squeeze:
        policies = policies[:, None, :]       # (P, 1, 2)
    P, N, _ = policies.shape

    policies = policies.astype(jnp.float32)
    # Layout plumbing (wrapper side): split the 2-wide action axis into two
    # lane-dense (P, N) planes so N sits on the 128-lane axis.
    p0 = policies[..., 0]
    p1 = policies[..., 1]
    attn = policy_attn.astype(jnp.float32).reshape(P, 1)

    o0, o1 = pl.pallas_call(
        _selector_kernel,
        out_shape=(jax.ShapeDtypeStruct((P, N), jnp.float32),
                   jax.ShapeDtypeStruct((P, N), jnp.float32)),
        # No grid / no BlockSpecs: the whole (tiny) problem is one full-array
        # block resident in VMEM.
        # TODO(synk): if N ever scales to HBM size, tile the lane-dense N axis
        # with a grid (parallel semantics for v7x's 2 TCs) and size blocks
        # against the 64 MiB VMEM budget.
    )(attn, p0, p1)

    out = jnp.stack([o0, o1], axis=-1)        # re-interleave actions -> (P, N, 2)
    if squeeze:
        out = out[:, 0, :]
    return out


if __name__ == "__main__":
    num_policies = 4
    N = 8
    A = 2  # CartPole action dim

    # Deterministic parameter init, matching nn.Parameter(ones * 1/num_policies)
    policy_attn = jnp.ones((num_policies,), dtype=jnp.float32) / num_policies

    key = jax.random.PRNGKey(0)
    policies_3d = jax.random.normal(key, (num_policies, N, A), dtype=jnp.float32)
    policies_2d = policies_3d[:, 0, :]  # (num_policies, 2)

    out_3d = jax.block_until_ready(cartpole_policy_selector(policies_3d, policy_attn))
    out_2d = jax.block_until_ready(cartpole_policy_selector(policies_2d, policy_attn))

    # Pure-JAX reference (same semantics as the PyTorch forward: raw attn, softmax dim=-1)
    ref_3d = jax.nn.softmax(policies_3d * policy_attn[:, None, None], axis=-1)
    ref_2d = jax.nn.softmax(policies_2d * policy_attn[:, None], axis=-1)

    assert out_3d.shape == (num_policies, N, A) and out_3d.dtype == jnp.float32
    assert out_2d.shape == (num_policies, A) and out_2d.dtype == jnp.float32
    assert jnp.allclose(out_3d, ref_3d, atol=1e-6, rtol=1e-6)
    assert jnp.allclose(out_2d, ref_2d, atol=1e-6, rtol=1e-6)

    print("KERNEL_OK")
</pallas_src>

<mosaic_0001>
module attributes {stable_mosaic.version = 11 : i64} {
  func.func @_selector_kernel(%arg0: memref<4x1xf32, #tpu.memory_space<vmem>>, %arg1: memref<4x8xf32, #tpu.memory_space<vmem>>, %arg2: memref<4x8xf32, #tpu.memory_space<vmem>>, %arg3: memref<4x8xf32, #tpu.memory_space<vmem>>, %arg4: memref<4x8xf32, #tpu.memory_space<vmem>>) attributes {dimension_semantics = [], scalar_prefetch = 0 : i64, scratch_operands = 0 : i64, tpu.core_type = #tpu.core_type<tc>} {
    %c0 = arith.constant 0 : index
    %c0_0 = arith.constant 0 : index
    %0 = vector.load %arg0[%c0, %c0_0] : memref<4x1xf32, #tpu.memory_space<vmem>>, vector<4x1xf32>
    %c0_1 = arith.constant 0 : index
    %c0_2 = arith.constant 0 : index
    %1 = vector.load %arg1[%c0_1, %c0_2] : memref<4x8xf32, #tpu.memory_space<vmem>>, vector<4x8xf32>
    %2 = vector.broadcast %0 : vector<4x1xf32> to vector<4x8xf32>
    %3 = arith.mulf %1, %2 : vector<4x8xf32>
    %c0_3 = arith.constant 0 : index
    %c0_4 = arith.constant 0 : index
    %4 = vector.load %arg2[%c0_3, %c0_4] : memref<4x8xf32, #tpu.memory_space<vmem>>, vector<4x8xf32>
    %5 = vector.broadcast %0 : vector<4x1xf32> to vector<4x8xf32>
    %6 = arith.mulf %4, %5 : vector<4x8xf32>
    %7 = arith.subf %6, %3 : vector<4x8xf32>
    %8 = math.exp %7 : vector<4x8xf32>
    %cst = arith.constant 1.000000e+00 : f32
    %9 = vector.broadcast %cst : f32 to vector<4x8xf32>
    %10 = arith.addf %9, %8 : vector<4x8xf32>
    %cst_5 = arith.constant 1.000000e+00 : f32
    %11 = vector.broadcast %cst_5 : f32 to vector<4x8xf32>
    %12 = arith.divf %11, %10 : vector<4x8xf32>
    %c0_6 = arith.constant 0 : index
    %c0_7 = arith.constant 0 : index
    %13 = vector.load %arg3[%c0_6, %c0_7] : memref<4x8xf32, #tpu.memory_space<vmem>>, vector<4x8xf32>
    tpu.vector_store %arg3[%c0_6, %c0_7], %12 {strides = array<i32>} : memref<4x8xf32, #tpu.memory_space<vmem>>, vector<4x8xf32>,
    %cst_8 = arith.constant 1.000000e+00 : f32
    %14 = vector.broadcast %cst_8 : f32 to vector<4x8xf32>
    %15 = arith.subf %14, %12 : vector<4x8xf32>
    %c0_9 = arith.constant 0 : index
    %c0_10 = arith.constant 0 : index
    %16 = vector.load %arg4[%c0_9, %c0_10] : memref<4x8xf32, #tpu.memory_space<vmem>>, vector<4x8xf32>
    tpu.vector_store %arg4[%c0_9, %c0_10], %15 {strides = array<i32>} : memref<4x8xf32, #tpu.memory_space<vmem>>, vector<4x8xf32>,
    return
  }
}

</mosaic_0001>

<bundles_post_ra>
// kernel: tpu_custom_call.1
= control target key start
LH: loop header
LB: loop body
LE: loop exit
PB: predicated region body
PF: predicated region fallthrough
CT: control target
= control target key end

     0   :  { %10 = vsyncpa [#allocation3], 0  ;;  %s229_s0 = inlined_call_operand.vmem [shape: f32[4,1], index: 0, kind: input, shape index: {}]   ;;  %s230_s1 = inlined_call_operand.vmem [shape: f32[4,8], index: 1, kind: input, shape index: {}]   ;;  %s231_s2 = inlined_call_operand.hbm [shape: f32[4,8], index: 2, kind: input, shape index: {}]   ;;  %s232_s3 = inlined_call_operand.hbm [shape: f32[4,8], index: 3, kind: output, shape index: {0}]   ;;  %s233_s4 = inlined_call_operand.hbm [shape: f32[4,8], index: 4, kind: output, shape index: {1}]  }
   0x1   :  { %11 = vsyncpa [#allocation4], 0 }
   0x2   :  { %12 = vsyncpa [#allocation7], 0  ;;  %s22_s17 = sshll.u32 %s231_s2, 4  ;;  %s185_s18 = smov [#allocation2]   ;;  %s23_s17 = int_to_ptr.hbm [resolvable:$true] %s22_s17 }
   0x3   :  { %s24_s19 = sshll.u32 %s185_s18, 4  ;;  %s25_s19 = int_to_ptr.vmem [resolvable:$true] %s24_s19 }
   0x4   :  { %27 = dma.hbm_to_vmem [thread:$0]  %s23_s17, 64, %s25_s19, [#allocation3]  }
   0x5   :  { %179 = dma.done.wait [#allocation3], 64  }
   0x6   :  { %180 = vsyncadd [#allocation3], 4294967232  ;;  %v186_v0 = vmov 0   ;;  %v32_v1 = vld [vmem:[%s229_s0] sm:$0xf]  ;;  %s187_s0 = smov [#allocation5]  }
   0x7   :  { %102 = vset.pattern.permute.xlu0 %v186_v0  ;;  %v33_v2 = vld [vmem:[%s230_s1] sm:$0xf]  ;;  %s70_s2 = sshll.u32 %s187_s0, 4  ;;  %s72_s25 = sshll.u32 %s232_s3, 4  ;;  %vm61_vm3 = vcmask 60416   ;;  %s71_s2 = int_to_ptr.vmem [resolvable:$true] %s70_s2  ;;  %s73_s25 = int_to_ptr.hbm [resolvable:$true] %s72_s25 }
   0x8   :  { %36 = vperm.xlu0 %102, %v32_v1   ;;  %v40_v3 = vld [vmem:[#allocation2] sm:$0xf]  ;;  %s188_s26 = smov [#allocation6]   ;;  %s83_s30 = sshll.u32 %s233_s4, 4  ;;  %s84_s30 = int_to_ptr.hbm [resolvable:$true] %s83_s30 }
   0x9   :  { %s81_s27 = sshll.u32 %s188_s26, 4  ;;  %s82_s27 = int_to_ptr.vmem [resolvable:$true] %s81_s27 }
  0x7a   :  { %v37_v4 = vpop.permute.xlu0 %36 }
  0x7b   :  { %v39_v5 = vmul.f32 %v37_v4, %v33_v2  ;;  %v41_v6 = vmul.f32 %v40_v3, %v37_v4 }
  0x7d   :  { %v42_v7 = vsub.f32 %v41_v6, %v39_v5 }
  0x7f   :  { %v43_v8 = vmul.f32 1.442695, %v42_v7 }
  0x81   :  { %103 = vpow2.f32 %v43_v8 }
  0x87   :  { %v104_v9 = vpop.eup %103 }
  0x88   :  { %v45_v10 = vadd.f32 1.0, %v104_v9 }
  0x8a   :  { %105 = vrcp.f32 %v45_v10  ;;  %v57_v14 = vand.u32 2147483648, %v45_v10  ;;  %v55_v16 = vand.u32 2147483647, %v45_v10  ;;  %vm51_vm1 = vweird.f32 %v45_v10 }
  0x8c   :  { %v58_v18 = vor.u32 1.1754944e-38, %v57_v14  ;;  %vm56_vm4 = vcmp.eq.f32.partialorder %v55_v16, 8.507059e+37 }
  0x90   :  { %v106_v11 = vpop.eup %105 }
  0x91   :  { %v47_v12 = vmul.f32 %v106_v11, %v45_v10  ;;  %vm52_vm0 = vweird.f32 %v106_v11 }
  0x92   :  { %vm53_vm2 = vmor %vm51_vm1, %vm52_vm0 }
  0x93   :  { %v48_v13 = vsub.f32 1.0, %v47_v12 }
  0x95   :  { %v49_v15 = vmul.f32 %v106_v11, %v48_v13 }
  0x97   :  { %v50_v17 = vadd.f32 %v106_v11, %v49_v15 }
  0x99   :  { %v54_v19 = vsel %vm53_vm2, %v106_v11, %v50_v17 }
  0x9a   :  { %v59_v20 = vsel %vm56_vm4, %v58_v18, %v54_v19 }
  0x9b   :  { %62 = vst.msk [vmem:[#allocation5] sm:$0xf] %vm61_vm3, %v59_v20  ;;  %v63_v21 = vsub.f32 1.0, %v59_v20 }
  0x9c   :  { %75 = dma.vmem_to_hbm [thread:$0]  %s71_s2, 64, %s73_s25, [#allocation4]  }
  0x9d   :  { %64 = vst.msk [vmem:[#allocation6] sm:$0xf] %vm61_vm3, %v63_v21 }
  0x9e   :  { %86 = dma.vmem_to_hbm [thread:$0]  %s82_s27, 64, %s84_s30, [#allocation7]  }
  0x9f   :  { %181 = dma.done.wait [#allocation4], 64  }
  0xa0   :  { %182 = vsyncadd [#allocation4], 4294967232 }
  0xa1   :  { %183 = dma.done.wait [#allocation7], 64  }
  0xa2   :  { %184 = vsyncadd [#allocation7], 4294967232 }
  0xa3   :  { %95 = vsyncpa [#allocation3], 1 }
  0xa4   :  { %96 = vsyncpa [#allocation4], 1 }
  0xa5   :  { %97 = vsyncpa [#allocation7], 1 }

</bundles_post_ra>
